<compile_context>
chip_gen: v6e
topology: v6e:2x2x1
jax: 0.10.0
libtpu: 0.0.40
codegen_flags: <defaults>
</compile_context>

<pallas_src>
import functools

import numpy as np
import jax
import jax.numpy as jnp
from jax import lax
from jax.experimental import pallas as pl
from jax.experimental.pallas import tpu as pltpu


def _recon_kernel(rho_ref, x_ref, mask_ref, a2_ref, b2_ref, or_ref, oi_ref):
    # Shapes (N = B*C):
    #   rho_ref : (1, 1)   f32, SMEM scalar
    #   x_ref   : (N*H, W) f32, rows ordered (n, h)   [bitcast view of NCHW]
    #   mask_ref: (H, W)   f32
    #   a2_ref  : (2H, H)  f32 = [[A_r], [A_i]]  (H-axis inverse-DFT, stacked)
    #   b2_ref  : (W, 2W)  f32 = [B_r | B_i]     (W-axis inverse-DFT, stacked)
    #   or_ref, oi_ref : (N*H, W) f32  (real / imag of ifft2, (n,h)-row order)
    H, W = mask_ref.shape
    N = x_ref.shape[0] // H

    # ---- elementwise prologue: done ONCE on the small (H, W) mask tile.
    rho = rho_ref[0, 0]
    denom = mask_ref[...] + rho
    denom = jnp.where(denom == 0.0, jnp.float32(1e-6), denom)
    # EUP approximate reciprocal (otherwise-idle unit) + one Newton step to
    # recover full f32 accuracy (denom may be 1e-6 -> result ~1e6).
    r = pl.reciprocal(denom, approx=True)
    inv = r * (jnp.float32(2.0) - denom * r)                     # (H, W)

    x = x_ref[...]                                               # (N*H, W)

    # ---- relayout #1: (n,h)-rows -> (H, N*W) slab, with the 1/denom scaling
    # fused into the per-image pieces.  Static slices + lane concat = explicit
    # spelling of transpose((N,H,W)->(H,N,W)); XLU/VPU are idle here.
    slab = jnp.concatenate(
        [x[n * H:(n + 1) * H, :] * inv for n in range(N)], axis=1)   # (H, N*W)

    # ---- H-axis IDFT: ONE stacked MXU issue (real input, complex A).
    u = jnp.dot(a2_ref[...], slab, preferred_element_type=jnp.float32)  # (2H, N*W)
    u_r = u[:H, :]                                               # A_r @ X per image
    u_i = u[H:, :]                                               # A_i @ X per image

    # ---- relayouts #2/#3: slabs back to (n,h)-row layout for the W-axis matmul.
    ur_rows = jnp.concatenate(
        [u_r[:, n * W:(n + 1) * W] for n in range(N)], axis=0)       # (N*H, W)
    ui_rows = jnp.concatenate(
        [u_i[:, n * W:(n + 1) * W] for n in range(N)], axis=0)       # (N*H, W)

    # ---- W-axis IDFT: TWO stacked MXU issues (complex x complex).
    p = jnp.dot(ur_rows, b2_ref[...], preferred_element_type=jnp.float32)  # [u_r@B_r | u_r@B_i]
    q = jnp.dot(ui_rows, b2_ref[...], preferred_element_type=jnp.float32)  # [u_i@B_r | u_i@B_i]

    # Y = A X B (complex): real = ArXBr - AiXBi, imag = ArXBi + AiXBr.
    or_ref[...] = p[:, :W] - q[:, W:]
    oi_ref[...] = p[:, W:] + q[:, :W]


@functools.lru_cache(maxsize=None)
def _dft_constants(H, W):
    """Inverse-DFT matrices so that ifft2(X) = A @ X @ B (A, B symmetric).

    Returned stacked: a2 = [[A_r],[A_i]] (2H,H), b2 = [B_r | B_i] (W,2W).
    Independent of the batch size (no kron), ~4 KB total at H=W=16.
    """
    mh = np.arange(H)
    A = np.exp(2j * np.pi * np.outer(mh, mh) / H) / H            # (H, H)
    mw = np.arange(W)
    Bm = np.exp(2j * np.pi * np.outer(mw, mw) / W) / W           # (W, W)
    a2 = np.concatenate([A.real, A.imag], axis=0).astype(np.float32)   # (2H, H)
    b2 = np.concatenate([Bm.real, Bm.imag], axis=1).astype(np.float32) # (W, 2W)
    return jnp.asarray(a2), jnp.asarray(b2)


def reconstruction_original_layer(x, mask, rho):
    """x: (B, C, H, W) float32; mask: (H, W) float32; rho: python float or scalar."""
    B, C, H, W = x.shape
    N = B * C
    a2, b2 = _dft_constants(H, W)

    rho_arr = jnp.asarray(rho, dtype=jnp.float32).reshape(1, 1)   # runtime SMEM scalar
    x_rows = x.reshape(N * H, W)                                  # free bitcast reshape
    mask_f = mask.astype(jnp.float32)

    out_r, out_i = pl.pallas_call(
        _recon_kernel,
        out_shape=(jax.ShapeDtypeStruct((N * H, W), jnp.float32),
                   jax.ShapeDtypeStruct((N * H, W), jnp.float32)),
        in_specs=[
            pl.BlockSpec(memory_space=pltpu.MemorySpace.SMEM),    # rho scalar
            pl.BlockSpec(memory_space=pltpu.MemorySpace.VMEM),    # x rows
            pl.BlockSpec(memory_space=pltpu.MemorySpace.VMEM),    # mask
            pl.BlockSpec(memory_space=pltpu.MemorySpace.VMEM),    # [[Ar],[Ai]]
            pl.BlockSpec(memory_space=pltpu.MemorySpace.VMEM),    # [Br|Bi]
        ],
        # No grid: the whole problem (~30 KB of payload + 4 KB constants)
        # fits in VMEM on v5e/v6e/v7x in a single invocation.
    )(rho_arr, x_rows, mask_f, a2, b2)

    # Only remaining wrapper op: assemble the complex64 result (Mosaic has no
    # complex dtype).  The reshape back to NCHW is a free bitcast.
    y = lax.complex(out_r, out_i).reshape(B, C, H, W)

    cs_data = {}
    cs_data['input'] = x
    cs_data['conv1_input'] = y
    return cs_data


if __name__ == "__main__":
    key = jax.random.PRNGKey(0)
    kx, km = jax.random.split(key)

    B, C, H, W = 2, 4, 16, 16
    x = jax.random.normal(kx, (B, C, H, W), dtype=jnp.float32)
    # Binary sampling mask (typical CSNet MRI mask).
    mask = (jax.random.uniform(km, (H, W)) > 0.5).astype(jnp.float32)

    def ref_impl(x_in, mask_in, rho_in):
        x_np = np.asarray(x_in)
        m_np = np.asarray(mask_in)
        denom = m_np + rho_in
        denom = np.where(denom == 0.0, 1e-6, denom).astype(np.float32)
        return np.fft.ifft2(x_np * (1.0 / denom), axes=(-2, -1))

    # rho = 0.0 exercises the where(denom == 0) -> 1e-6 branch; rho = 0.25 is
    # the generic path.  rho is a runtime scalar, so no recompile between them.
    for rho in (0.0, 0.25):
        cs_data = reconstruction_original_layer(x, mask, rho)
        out = jax.block_until_ready(cs_data['conv1_input'])
        jax.block_until_ready(cs_data['input'])

        ref = ref_impl(x, mask, rho)
        # atol scaled to the data magnitude (masked entries are amplified ~1e6
        # by the 1e-6 denominator floor when rho == 0).
        atol = max(1e-5, 1e-6 * float(np.abs(ref).max()))
        assert np.allclose(np.asarray(out), ref, rtol=1e-4, atol=atol), f"mismatch at rho={rho}"
        assert np.array_equal(np.asarray(cs_data['input']), np.asarray(x))

    print("KERNEL_OK")
</pallas_src>

<mosaic_0001>
module attributes {stable_mosaic.version = 11 : i64} {
  func.func @_recon_kernel(%arg0: memref<1x1xf32, #tpu.memory_space<smem>>, %arg1: memref<128x16xf32, #tpu.memory_space<vmem>>, %arg2: memref<16x16xf32, #tpu.memory_space<vmem>>, %arg3: memref<32x16xf32, #tpu.memory_space<vmem>>, %arg4: memref<16x32xf32, #tpu.memory_space<vmem>>, %arg5: memref<128x16xf32, #tpu.memory_space<vmem>>, %arg6: memref<128x16xf32, #tpu.memory_space<vmem>>) attributes {dimension_semantics = [], scalar_prefetch = 0 : i64, scratch_operands = 0 : i64, tpu.core_type = #tpu.core_type<tc>} {
    %c0 = arith.constant 0 : index
    %c0_0 = arith.constant 0 : index
    %0 = memref.load %arg0[%c0, %c0_0] : memref<1x1xf32, #tpu.memory_space<smem>>
    %c0_1 = arith.constant 0 : index
    %c0_2 = arith.constant 0 : index
    %1 = vector.load %arg2[%c0_1, %c0_2] : memref<16x16xf32, #tpu.memory_space<vmem>>, vector<16x16xf32>
    %2 = vector.broadcast %0 : f32 to vector<16x16xf32>
    %3 = arith.addf %1, %2 : vector<16x16xf32>
    %cst = arith.constant 0.000000e+00 : f32
    %4 = vector.broadcast %cst : f32 to vector<16x16xf32>
    %5 = arith.cmpf oeq, %3, %4 : vector<16x16xf32>
    %cst_3 = arith.constant 9.99999997E-7 : f32
    %6 = vector.broadcast %cst_3 : f32 to vector<16x16xf32>
    %7 = arith.select %5, %6, %3 : vector<16x16xi1>, vector<16x16xf32>
    %8 = tpu.reciprocal %7 {approx = true} : vector<16x16xf32> -> vector<16x16xf32>
    %9 = arith.mulf %7, %8 : vector<16x16xf32>
    %cst_4 = arith.constant 2.000000e+00 : f32
    %10 = vector.broadcast %cst_4 : f32 to vector<16x16xf32>
    %11 = arith.subf %10, %9 : vector<16x16xf32>
    %12 = arith.mulf %8, %11 : vector<16x16xf32>
    %c0_5 = arith.constant 0 : index
    %c0_6 = arith.constant 0 : index
    %13 = vector.load %arg1[%c0_5, %c0_6] : memref<128x16xf32, #tpu.memory_space<vmem>>, vector<128x16xf32>
    %14 = vector.extract_strided_slice %13 {offsets = [0, 0], sizes = [16, 16], strides = [1, 1]} : vector<128x16xf32> to vector<16x16xf32>
    %15 = arith.mulf %14, %12 : vector<16x16xf32>
    %16 = vector.extract_strided_slice %13 {offsets = [16, 0], sizes = [16, 16], strides = [1, 1]} : vector<128x16xf32> to vector<16x16xf32>
    %17 = arith.mulf %16, %12 : vector<16x16xf32>
    %18 = vector.extract_strided_slice %13 {offsets = [32, 0], sizes = [16, 16], strides = [1, 1]} : vector<128x16xf32> to vector<16x16xf32>
    %19 = arith.mulf %18, %12 : vector<16x16xf32>
    %20 = vector.extract_strided_slice %13 {offsets = [48, 0], sizes = [16, 16], strides = [1, 1]} : vector<128x16xf32> to vector<16x16xf32>
    %21 = arith.mulf %20, %12 : vector<16x16xf32>
    %22 = vector.extract_strided_slice %13 {offsets = [64, 0], sizes = [16, 16], strides = [1, 1]} : vector<128x16xf32> to vector<16x16xf32>
    %23 = arith.mulf %22, %12 : vector<16x16xf32>
    %24 = vector.extract_strided_slice %13 {offsets = [80, 0], sizes = [16, 16], strides = [1, 1]} : vector<128x16xf32> to vector<16x16xf32>
    %25 = arith.mulf %24, %12 : vector<16x16xf32>
    %26 = vector.extract_strided_slice %13 {offsets = [96, 0], sizes = [16, 16], strides = [1, 1]} : vector<128x16xf32> to vector<16x16xf32>
    %27 = arith.mulf %26, %12 : vector<16x16xf32>
    %28 = vector.extract_strided_slice %13 {offsets = [112, 0], sizes = [16, 16], strides = [1, 1]} : vector<128x16xf32> to vector<16x16xf32>
    %29 = arith.mulf %28, %12 : vector<16x16xf32>
    %30 = tpu.concatenate %15, %17, %19, %21, %23, %25, %27, %29 in 1 : vector<16x16xf32>, vector<16x16xf32>, vector<16x16xf32>, vector<16x16xf32>, vector<16x16xf32>, vector<16x16xf32>, vector<16x16xf32>, vector<16x16xf32> -> vector<16x128xf32>
    %c0_7 = arith.constant 0 : index
    %c0_8 = arith.constant 0 : index
    %31 = vector.load %arg3[%c0_7, %c0_8] : memref<32x16xf32, #tpu.memory_space<vmem>>, vector<32x16xf32>
    %cst_9 = arith.constant dense<0.000000e+00> : vector<32x128xf32>
    %32 = tpu.matmul %31, %30, %cst_9 {dimension_numbers = #tpu.dot_dimension_numbers<[1], [0], [0], [1], [0, 0, 1, 1], [], []>} : vector<32x16xf32>, vector<16x128xf32>, vector<32x128xf32> -> vector<32x128xf32>
    %33 = vector.extract_strided_slice %32 {offsets = [0, 0], sizes = [16, 128], strides = [1, 1]} : vector<32x128xf32> to vector<16x128xf32>
    %34 = vector.extract_strided_slice %32 {offsets = [16, 0], sizes = [16, 128], strides = [1, 1]} : vector<32x128xf32> to vector<16x128xf32>
    %35 = vector.extract_strided_slice %33 {offsets = [0, 0], sizes = [16, 16], strides = [1, 1]} : vector<16x128xf32> to vector<16x16xf32>
    %36 = vector.extract_strided_slice %33 {offsets = [0, 16], sizes = [16, 16], strides = [1, 1]} : vector<16x128xf32> to vector<16x16xf32>
    %37 = vector.extract_strided_slice %33 {offsets = [0, 32], sizes = [16, 16], strides = [1, 1]} : vector<16x128xf32> to vector<16x16xf32>
    %38 = vector.extract_strided_slice %33 {offsets = [0, 48], sizes = [16, 16], strides = [1, 1]} : vector<16x128xf32> to vector<16x16xf32>
    %39 = vector.extract_strided_slice %33 {offsets = [0, 64], sizes = [16, 16], strides = [1, 1]} : vector<16x128xf32> to vector<16x16xf32>
    %40 = vector.extract_strided_slice %33 {offsets = [0, 80], sizes = [16, 16], strides = [1, 1]} : vector<16x128xf32> to vector<16x16xf32>
    %41 = vector.extract_strided_slice %33 {offsets = [0, 96], sizes = [16, 16], strides = [1, 1]} : vector<16x128xf32> to vector<16x16xf32>
    %42 = vector.extract_strided_slice %33 {offsets = [0, 112], sizes = [16, 16], strides = [1, 1]} : vector<16x128xf32> to vector<16x16xf32>
    %43 = tpu.concatenate %35, %36, %37, %38, %39, %40, %41, %42 in 0 : vector<16x16xf32>, vector<16x16xf32>, vector<16x16xf32>, vector<16x16xf32>, vector<16x16xf32>, vector<16x16xf32>, vector<16x16xf32>, vector<16x16xf32> -> vector<128x16xf32>
    %44 = vector.extract_strided_slice %34 {offsets = [0, 0], sizes = [16, 16], strides = [1, 1]} : vector<16x128xf32> to vector<16x16xf32>
    %45 = vector.extract_strided_slice %34 {offsets = [0, 16], sizes = [16, 16], strides = [1, 1]} : vector<16x128xf32> to vector<16x16xf32>
    %46 = vector.extract_strided_slice %34 {offsets = [0, 32], sizes = [16, 16], strides = [1, 1]} : vector<16x128xf32> to vector<16x16xf32>
    %47 = vector.extract_strided_slice %34 {offsets = [0, 48], sizes = [16, 16], strides = [1, 1]} : vector<16x128xf32> to vector<16x16xf32>
    %48 = vector.extract_strided_slice %34 {offsets = [0, 64], sizes = [16, 16], strides = [1, 1]} : vector<16x128xf32> to vector<16x16xf32>
    %49 = vector.extract_strided_slice %34 {offsets = [0, 80], sizes = [16, 16], strides = [1, 1]} : vector<16x128xf32> to vector<16x16xf32>
    %50 = vector.extract_strided_slice %34 {offsets = [0, 96], sizes = [16, 16], strides = [1, 1]} : vector<16x128xf32> to vector<16x16xf32>
    %51 = vector.extract_strided_slice %34 {offsets = [0, 112], sizes = [16, 16], strides = [1, 1]} : vector<16x128xf32> to vector<16x16xf32>
    %52 = tpu.concatenate %44, %45, %46, %47, %48, %49, %50, %51 in 0 : vector<16x16xf32>, vector<16x16xf32>, vector<16x16xf32>, vector<16x16xf32>, vector<16x16xf32>, vector<16x16xf32>, vector<16x16xf32>, vector<16x16xf32> -> vector<128x16xf32>
    %c0_10 = arith.constant 0 : index
    %c0_11 = arith.constant 0 : index
    %53 = vector.load %arg4[%c0_10, %c0_11] : memref<16x32xf32, #tpu.memory_space<vmem>>, vector<16x32xf32>
    %cst_12 = arith.constant dense<0.000000e+00> : vector<128x32xf32>
    %54 = tpu.matmul %43, %53, %cst_12 {dimension_numbers = #tpu.dot_dimension_numbers<[1], [0], [0], [1], [0, 0, 1, 1], [], []>} : vector<128x16xf32>, vector<16x32xf32>, vector<128x32xf32> -> vector<128x32xf32>
    %c0_13 = arith.constant 0 : index
    %c0_14 = arith.constant 0 : index
    %55 = vector.load %arg4[%c0_13, %c0_14] : memref<16x32xf32, #tpu.memory_space<vmem>>, vector<16x32xf32>
    %cst_15 = arith.constant dense<0.000000e+00> : vector<128x32xf32>
    %56 = tpu.matmul %52, %55, %cst_15 {dimension_numbers = #tpu.dot_dimension_numbers<[1], [0], [0], [1], [0, 0, 1, 1], [], []>} : vector<128x16xf32>, vector<16x32xf32>, vector<128x32xf32> -> vector<128x32xf32>
    %57 = vector.extract_strided_slice %54 {offsets = [0, 0], sizes = [128, 16], strides = [1, 1]} : vector<128x32xf32> to vector<128x16xf32>
    %58 = vector.extract_strided_slice %56 {offsets = [0, 16], sizes = [128, 16], strides = [1, 1]} : vector<128x32xf32> to vector<128x16xf32>
    %59 = arith.subf %57, %58 : vector<128x16xf32>
    %c0_16 = arith.constant 0 : index
    %c0_17 = arith.constant 0 : index
    %60 = vector.load %arg5[%c0_16, %c0_17] : memref<128x16xf32, #tpu.memory_space<vmem>>, vector<128x16xf32>
    tpu.vector_store %arg5[%c0_16, %c0_17], %59 {strides = array<i32>} : memref<128x16xf32, #tpu.memory_space<vmem>>, vector<128x16xf32>,
    %61 = vector.extract_strided_slice %54 {offsets = [0, 16], sizes = [128, 16], strides = [1, 1]} : vector<128x32xf32> to vector<128x16xf32>
    %62 = vector.extract_strided_slice %56 {offsets = [0, 0], sizes = [128, 16], strides = [1, 1]} : vector<128x32xf32> to vector<128x16xf32>
    %63 = arith.addf %61, %62 : vector<128x16xf32>
    %c0_18 = arith.constant 0 : index
    %c0_19 = arith.constant 0 : index
    %64 = vector.load %arg6[%c0_18, %c0_19] : memref<128x16xf32, #tpu.memory_space<vmem>>, vector<128x16xf32>
    tpu.vector_store %arg6[%c0_18, %c0_19], %63 {strides = array<i32>} : memref<128x16xf32, #tpu.memory_space<vmem>>, vector<128x16xf32>,
    return
  }
}

</mosaic_0001>

<bundles_post_ra>
// kernel: tpu_custom_call.1
= control target key start
LH: loop header
LB: loop body
LE: loop exit
PB: predicated region body
PF: predicated region fallthrough
CT: control target
= control target key end

     0   :  { %s1074_s13 = smov 16   ;;  %s1075_s18 = smov 32   ;;  %vm129_vm2 = vcmask 130048   ;;  %vm132_vm3 = vcmask 261120   ;;  %vm135_vm4 = vcmask 392192   ;;  %vm138_vm5 = vcmask 523264   ;;  %s1492_s0 = inlined_call_operand.<no memory space> [shape: f32[1,1], index: 0, kind: input, shape index: {}]   ;;  %s1493_s2 = inlined_call_operand.vmem [shape: f32[16,16], index: 2, kind: input, shape index: {}]   ;;  %s1494_s1 = inlined_call_operand.vmem [shape: f32[128,16], index: 1, kind: input, shape index: {}]   ;;  %s1495_s3 = inlined_call_operand.vmem [shape: f32[32,16], index: 3, kind: input, shape index: {}]   ;;  %s1496_s4 = inlined_call_operand.vmem [shape: f32[16,32], index: 4, kind: input, shape index: {}]   ;;  %s1497_s5 = inlined_call_operand.vmem [shape: f32[128,16], index: 5, kind: output, shape index: {0}]   ;;  %s1498_s6 = inlined_call_operand.vmem [shape: f32[128,16], index: 6, kind: output, shape index: {1}]  }
   0x1   :  { %v25_v0 = vld [vmem:[%s1493_s2 + $0x8] sm:$0xff]  ;;  %v26_v1 = vstv %s1492_s0  ;;  %v24_v2 = vld [vmem:[%s1493_s2] sm:$0xff]  ;;  %v44_v12 = vld [vmem:[%s1494_s1 + $0x18] sm:$0xff]  ;;  %s1076_s19 = smov 48   ;;  %s1077_s24 = smov 64   ;;  %vm141_vm6 = vcmask 654336  }
   0x2   :  { %v28_v3 = vadd.f32 %v26_v1, %v25_v0  ;;  %v27_v4 = vadd.f32 %v26_v1, %v24_v2  ;;  %v43_v15 = vld [vmem:[%s1494_s1 + $0x10] sm:$0xff]  ;;  %v46_v17 = vld [vmem:[%s1494_s1 + $0x28] sm:$0xff]  ;;  %v48_v19 = vld [vmem:[%s1494_s1 + $0x38] sm:$0xff]  ;;  %s1078_s0 = smov 80   ;;  %s1079_s12 = smov 96   ;;  %vm144_vm7 = vcmask 785408  }
   0x3   :  { %v42_v20 = vld [vmem:[%s1494_s1 + $0x8] sm:$0xff]  ;;  %v41_v21 = vld [vmem:[%s1494_s1] sm:$0xff]  ;;  %v47_v31 = vld [vmem:[%s1494_s1 + $0x30] sm:$0xff]  ;;  %s1080_s20 = smov 112   ;;  %vm147_vm8 = vcmask 916480  }
   0x4   :  { %vm30_vm0 = vcmp.eq.f32.partialorder %v28_v3, 0.0  ;;  %vm29_vm1 = vcmp.eq.f32.partialorder %v27_v4, 0.0  ;;  %v45_v25 = vld [vmem:[%s1494_s1 + $0x20] sm:$0xff]  ;;  %v50_v28 = vld [vmem:[%s1494_s1 + $0x48] sm:$0xff]  ;;  %v52_v32 = vld [vmem:[%s1494_s1 + $0x58] sm:$0xff] }
   0x5   :  { %v32_v5 = vsel %vm30_vm0, 1e-06, %v28_v3  ;;  %v31_v6 = vsel %vm29_vm1, 1e-06, %v27_v4  ;;  %v49_v35 = vld [vmem:[%s1494_s1 + $0x40] sm:$0xff]  ;;  %v54_v36 = vld [vmem:[%s1494_s1 + $0x68] sm:$0xff] }
   0x6   :  { %1070 = vrcp.f32 %v32_v5  ;;  %v51_v39 = vld [vmem:[%s1494_s1 + $0x50] sm:$0xff]  ;;  %v56_v40 = vld [vmem:[%s1494_s1 + $0x78] sm:$0xff]  ;;  %v150_v42 = vld [vmem:[%s1495_s3] sm:$0xff] }
   0x7   :  { %1072 = vrcp.f32 %v31_v6  ;;  %v152_v41 = vld [vmem:[%s1495_s3 + $0x10] sm:$0xff]  ;;  %997 = vmatprep.mubr.msk.f32.mxu0 %vm129_vm2, %v150_v42  ;;  %v53_v45 = vld [vmem:[%s1494_s1 + $0x60] sm:$0xff] }
   0x8   :  { %1000 = vmatprep.mubr.msk.f32.mxu1 %vm129_vm2, %v152_v41  ;;  %v55_v46 = vld [vmem:[%s1494_s1 + $0x70] sm:$0xff] }
  0x13   :  { %v1071_v7 = vpop.eup %1070 }
  0x14   :  { %v1073_v8 = vpop.eup %1072  ;;  %v36_v9 = vmul.f32 %v1071_v7, %v32_v5 }
  0x15   :  { %v35_v10 = vmul.f32 %v1073_v8, %v31_v6 }
  0x16   :  { %v38_v11 = vsub.f32 2.0, %v36_v9 }
  0x17   :  { %v37_v13 = vsub.f32 2.0, %v35_v10 }
  0x18   :  { %v40_v14 = vmul.f32 %v1071_v7, %v38_v11 }
  0x19   :  { %v39_v16 = vmul.f32 %v1073_v8, %v37_v13  ;;  %v153_v13 = vld [vmem:[%s1495_s3 + $0x18] sm:$0xff] }
  0x1a   :  { %v60_v18 = vmul.f32 %v44_v12, %v40_v14  ;;  %v62_v23 = vmul.f32 %v46_v17, %v40_v14  ;;  %v64_v24 = vmul.f32 %v48_v19, %v40_v14  ;;  %v58_v26 = vmul.f32 %v42_v20, %v40_v14 }
  0x1b   :  { %v59_v22 = vmul.f32 %v43_v15, %v39_v16  ;;  %v1148_v27 = vmul.f32 %v41_v21, %v39_v16  ;;  %v61_v29 = vmul.f32 %v45_v25, %v39_v16  ;;  %v66_v30 = vmul.f32 %v50_v28, %v40_v14  ;;  %v312_v15 = vld [vmem:[%s1496_s4 + $0x8] sm:$0xff] }
  0x1c   :  { %77 = vrot.lane.b32.xlu0 %v60_v18, %s1074_s13  ;;  %v63_v33 = vmul.f32 %v47_v31, %v39_v16  ;;  %v68_v34 = vmul.f32 %v52_v32, %v40_v14  ;;  %v65_v37 = vmul.f32 %v49_v35, %v39_v16  ;;  %v70_v38 = vmul.f32 %v54_v36, %v40_v14 }
  0x1d   :  { %75 = vrot.lane.b32.xlu1 %v59_v22, %s1074_s13  ;;  %v67_v43 = vmul.f32 %v51_v39, %v39_v16  ;;  %v72_v44 = vmul.f32 %v56_v40, %v40_v14  ;;  %v69_v47 = vmul.f32 %v53_v45, %v39_v16  ;;  %v71_v48 = vmul.f32 %v55_v46, %v39_v16  ;;  %v151_v14 = vld [vmem:[%s1495_s3 + $0x8] sm:$0xff]  ;;  %v311_v16 = vld [vmem:[%s1496_s4] sm:$0xff] }
  0x20   :  { %85 = vrot.lane.b32.xlu0 %v62_v23, %s1075_s18 }
  0x21   :  { %93 = vrot.lane.b32.xlu1 %v64_v24, %s1076_s19 }
  0x24   :  { %83 = vrot.lane.b32.xlu0 %v61_v29, %s1075_s18 }
  0x25   :  { %101 = vrot.lane.b32.xlu1 %v66_v30, %s1077_s24 }
  0x28   :  { %91 = vrot.lane.b32.xlu0 %v63_v33, %s1076_s19 }
  0x29   :  { %109 = vrot.lane.b32.xlu1 %v68_v34, %s1078_s0 }
  0x2c   :  { %99 = vrot.lane.b32.xlu0 %v65_v37, %s1077_s24 }
  0x2d   :  { %117 = vrot.lane.b32.xlu1 %v70_v38, %s1079_s12 }
  0x30   :  { %107 = vrot.lane.b32.xlu0 %v67_v43, %s1078_s0 }
  0x31   :  { %125 = vrot.lane.b32.xlu1 %v72_v44, %s1080_s20 }
  0x34   :  { %115 = vrot.lane.b32.xlu0 %v69_v47, %s1079_s12 }
  0x35   :  { %123 = vrot.lane.b32.xlu1 %v71_v48, %s1080_s20 }
  0x8e   :  { %v78_v49 = vpop.permute.xlu0 %77 }
  0x8f   :  { %v76_v50 = vpop.permute.xlu1 %75  ;;  %v131_v57 = vsel %vm129_vm2, %v58_v26, %v78_v49 }
  0x90   :  { %v130_v63 = vsel %vm129_vm2, %v1148_v27, %v76_v50 }
  0x92   :  { %v86_v51 = vpop.permute.xlu0 %85 }
  0x93   :  { %v94_v52 = vpop.permute.xlu1 %93  ;;  %v134_v58 = vsel %vm132_vm3, %v131_v57, %v86_v51 }
  0x94   :  { %v137_v61 = vsel %vm135_vm4, %v134_v58, %v94_v52 }
  0x96   :  { %v84_v53 = vpop.permute.xlu0 %83 }
  0x97   :  { %v102_v54 = vpop.permute.xlu1 %101  ;;  %v133_v2 = vsel %vm132_vm3, %v130_v63, %v84_v53 }
  0x98   :  { %v140_v62 = vsel %vm138_vm5, %v137_v61, %v102_v54 }
  0x9a   :  { %v92_v55 = vpop.permute.xlu0 %91 }
  0x9b   :  { %v110_v56 = vpop.permute.xlu1 %109  ;;  %v136_v5 = vsel %vm135_vm4, %v133_v2, %v92_v55 }
  0x9c   :  { %v143_v0 = vsel %vm141_vm6, %v140_v62, %v110_v56 }
  0x9e   :  { %v100_v59 = vpop.permute.xlu0 %99 }
  0x9f   :  { %v118_v60 = vpop.permute.xlu1 %117  ;;  %v139_v7 = vsel %vm138_vm5, %v136_v5, %v100_v59 }
  0xa0   :  { %v146_v3 = vsel %vm144_vm7, %v143_v0, %v118_v60 }
  0xa2   :  { %v108_v1 = vpop.permute.xlu0 %107 }
  0xa3   :  { %v126_v4 = vpop.permute.xlu1 %125  ;;  %v142_v8 = vsel %vm141_vm6, %v139_v7, %v108_v1 }
  0xa4   :  { %v149_v6 = vsel %vm147_vm8, %v146_v3, %v126_v4 }
  0xa5   :  { %993 = vmatprep.subr.mxu0 %v149_v6  ;;  %1059 = vmatprep.subr.mxu1 %v149_v6 }
  0xa6   :  { %994 = vmatpush3.msra.mxu0 %v149_v6  ;;  %1061 = vmatpush3.msra.mxu1 %v149_v6  ;;  %v116_v9 = vpop.permute.xlu0 %115 }
  0xa7   :  { %v145_v10 = vsel %vm144_vm7, %v142_v8, %v116_v9  ;;  %v124_v11 = vpop.permute.xlu1 %123 }
  0xa8   :  { %v148_v12 = vsel %vm147_vm8, %v145_v10, %v124_v11 }
  0xa9   :  { %995 = vmatprep.subr.mxu0 %v148_v12  ;;  %1060 = vmatprep.subr.mxu1 %v148_v12 }
  0xaa   :  { %996 = vmatpush3.msra.mxu0 %v148_v12  ;;  %1062 = vmatpush3.msra.mxu1 %v148_v12 }
  0xab   :  { %1001 = vmatmul.mubr.msk.f32.vlgmr.msra.gmra.mxu1 %vm129_vm2, %v153_v13  ;;  %998 = vmatmul.mubr.msk.f32.vlgmr.msra.gmra.mxu0 %vm129_vm2, %v151_v14 }
  0xac   :  { %1031 = vmatprep.subr.mxu0 %v312_v15  ;;  %1003 = vmatprep.subr.mxu1 %v312_v15 }
  0xad   :  { %1032 = vmatpush3.msra.mxu0 %v312_v15  ;;  %1004 = vmatpush3.msra.mxu1 %v312_v15 }
  0xae   :  { %1033 = vmatprep.subr.mxu0 %v311_v16  ;;  %1005 = vmatprep.subr.mxu1 %v311_v16 }
  0xaf   :  { %1034 = vmatpush3.msra.mxu0 %v311_v16  ;;  %1006 = vmatpush3.msra.mxu1 %v311_v16 }
 0x16b   :  { %v1002_v17 = vpop.f32.mrf.mxu1  ;;  %v999_v18 = vpop.f32.mrf.mxu0 }
 0x16c   :  { %285 = vrot.lane.b32.xlu1 %v1002_v17, %s1080_s20 }
 0x16d   :  { %v242_v19 = vpop.f32.mrf.mxu1  ;;  %v232_v20 = vpop.f32.mrf.mxu0 }
 0x16e   :  { %283 = vrot.lane.b32.xlu0 %v242_v19, %s1080_s20  ;;  %1035 = vmatprep.mubr.msk.f32.mxu0 %vm129_vm2, %v242_v19 }
 0x16f   :  { %1036 = vmatmul.mubr.msk.f32.vlgmr.msra.gmra.mxu0 %vm129_vm2, %v1002_v17  ;;  %1007 = vmatprep.mubr.msk.f32.mxu1 %vm129_vm2, %v232_v20 }
 0x170   :  { %289 = vrot.lane.b32.xlu1 %v1002_v17, %s1079_s12  ;;  %1008 = vmatmul.mubr.msk.f32.vlgmr.msra.gmra.mxu1 %vm129_vm2, %v999_v18 }
 0x172   :  { %287 = vrot.lane.b32.xlu0 %v242_v19, %s1079_s12 }
 0x174   :  { %293 = vrot.lane.b32.xlu1 %v1002_v17, %s1078_s0 }
 0x176   :  { %291 = vrot.lane.b32.xlu0 %v242_v19, %s1078_s0 }
 0x178   :  { %297 = vrot.lane.b32.xlu1 %v1002_v17, %s1077_s24 }
 0x17a   :  { %295 = vrot.lane.b32.xlu0 %v242_v19, %s1077_s24 }
 0x17c   :  { %301 = vrot.lane.b32.xlu1 %v1002_v17, %s1076_s19 }
 0x17e   :  { %299 = vrot.lane.b32.xlu0 %v242_v19, %s1076_s19 }
 0x180   :  { %305 = vrot.lane.b32.xlu1 %v1002_v17, %s1075_s18 }
 0x182   :  { %303 = vrot.lane.b32.xlu0 %v242_v19, %s1075_s18 }
 0x184   :  { %309 = vrot.lane.b32.xlu1 %v1002_v17, %s1074_s13 }
 0x186   :  { %307 = vrot.lane.b32.xlu0 %v242_v19, %s1074_s13 }
 0x188   :  { %255 = vrot.lane.b32.xlu1 %v999_v18, %s1080_s20 }
 0x18a   :  { %253 = vrot.lane.b32.xlu0 %v232_v20, %s1080_s20 }
 0x18c   :  { %259 = vrot.lane.b32.xlu1 %v999_v18, %s1079_s12 }
 0x18e   :  { %257 = vrot.lane.b32.xlu0 %v232_v20, %s1079_s12 }
 0x190   :  { %263 = vrot.lane.b32.xlu1 %v999_v18, %s1078_s0 }
 0x192   :  { %261 = vrot.lane.b32.xlu0 %v232_v20, %s1078_s0 }
 0x194   :  { %267 = vrot.lane.b32.xlu1 %v999_v18, %s1077_s24 }
 0x196   :  { %265 = vrot.lane.b32.xlu0 %v232_v20, %s1077_s24 }
 0x198   :  { %271 = vrot.lane.b32.xlu1 %v999_v18, %s1076_s19 }
 0x19a   :  { %269 = vrot.lane.b32.xlu0 %v232_v20, %s1076_s19 }
 0x19c   :  { %275 = vrot.lane.b32.xlu1 %v999_v18, %s1075_s18 }
 0x19e   :  { %273 = vrot.lane.b32.xlu0 %v232_v20, %s1075_s18 }
 0x1a0   :  { %279 = vrot.lane.b32.xlu1 %v999_v18, %s1074_s13 }
 0x1a2   :  { %277 = vrot.lane.b32.xlu0 %v232_v20, %s1074_s13 }
 0x1de   :  { %v286_v21 = vpop.permute.xlu1 %285 }
 0x1e0   :  { %v284_v22 = vpop.permute.xlu0 %283 }
 0x1e1   :  { %1038 = vmatprep.mubr.msk.f32.mxu0 %vm129_vm2, %v284_v22 }
 0x1e2   :  { %v290_v23 = vpop.permute.xlu1 %289  ;;  %1039 = vmatmul.mubr.msk.f32.gmra.mxu0 %vm129_vm2, %v286_v21 }
 0x1e4   :  { %v288_v24 = vpop.permute.xlu0 %287 }
 0x1e5   :  { %1041 = vmatprep.mubr.msk.f32.mxu0 %vm129_vm2, %v288_v24 }
 0x1e6   :  { %v294_v25 = vpop.permute.xlu1 %293  ;;  %1042 = vmatmul.mubr.msk.f32.gmra.mxu0 %vm129_vm2, %v290_v23 }
 0x1e8   :  { %v292_v26 = vpop.permute.xlu0 %291 }
 0x1e9   :  { %1044 = vmatprep.mubr.msk.f32.mxu0 %vm129_vm2, %v292_v26 }
 0x1ea   :  { %v298_v27 = vpop.permute.xlu1 %297  ;;  %1045 = vmatmul.mubr.msk.f32.gmra.mxu0 %vm129_vm2, %v294_v25 }
 0x1ec   :  { %v296_v28 = vpop.permute.xlu0 %295 }
 0x1ed   :  { %1047 = vmatprep.mubr.msk.f32.mxu0 %vm129_vm2, %v296_v28 }
 0x1ee   :  { %v302_v29 = vpop.permute.xlu1 %301  ;;  %1048 = vmatmul.mubr.msk.f32.gmra.mxu0 %vm129_vm2, %v298_v27 }
 0x1f0   :  { %v300_v30 = vpop.permute.xlu0 %299 }
 0x1f1   :  { %1050 = vmatprep.mubr.msk.f32.mxu0 %vm129_vm2, %v300_v30 }
 0x1f2   :  { %v306_v31 = vpop.permute.xlu1 %305  ;;  %1051 = vmatmul.mubr.msk.f32.gmra.mxu0 %vm129_vm2, %v302_v29 }
 0x1f4   :  { %v304_v32 = vpop.permute.xlu0 %303 }
 0x1f5   :  { %1053 = vmatprep.mubr.msk.f32.mxu0 %vm129_vm2, %v304_v32 }
 0x1f6   :  { %v310_v33 = vpop.permute.xlu1 %309  ;;  %1054 = vmatmul.mubr.msk.f32.gmra.mxu0 %vm129_vm2, %v306_v31 }
 0x1f8   :  { %v308_v34 = vpop.permute.xlu0 %307 }
 0x1f9   :  { %1056 = vmatprep.mubr.msk.f32.mxu0 %vm129_vm2, %v308_v34 }
 0x1fa   :  { %1057 = vmatmul.mubr.msk.f32.gmra.mxu0 %vm129_vm2, %v310_v33  ;;  %v256_v35 = vpop.permute.xlu1 %255 }
 0x1fc   :  { %v254_v36 = vpop.permute.xlu0 %253 }
 0x1fd   :  { %1010 = vmatprep.mubr.msk.f32.mxu1 %vm129_vm2, %v254_v36 }
 0x1fe   :  { %1011 = vmatmul.mubr.msk.f32.gmra.mxu1 %vm129_vm2, %v256_v35  ;;  %v260_v37 = vpop.permute.xlu1 %259 }
 0x200   :  { %v258_v38 = vpop.permute.xlu0 %257 }
 0x201   :  { %1013 = vmatprep.mubr.msk.f32.mxu1 %vm129_vm2, %v258_v38 }
 0x202   :  { %1014 = vmatmul.mubr.msk.f32.gmra.mxu1 %vm129_vm2, %v260_v37  ;;  %v264_v39 = vpop.permute.xlu1 %263 }
 0x204   :  { %v262_v40 = vpop.permute.xlu0 %261 }
 0x205   :  { %1016 = vmatprep.mubr.msk.f32.mxu1 %vm129_vm2, %v262_v40 }
 0x206   :  { %1017 = vmatmul.mubr.msk.f32.gmra.mxu1 %vm129_vm2, %v264_v39  ;;  %v268_v41 = vpop.permute.xlu1 %267 }
 0x208   :  { %v266_v42 = vpop.permute.xlu0 %265 }
 0x209   :  { %1019 = vmatprep.mubr.msk.f32.mxu1 %vm129_vm2, %v266_v42 }
 0x20a   :  { %1020 = vmatmul.mubr.msk.f32.gmra.mxu1 %vm129_vm2, %v268_v41  ;;  %v272_v43 = vpop.permute.xlu1 %271 }
 0x20c   :  { %v270_v44 = vpop.permute.xlu0 %269 }
 0x20d   :  { %1022 = vmatprep.mubr.msk.f32.mxu1 %vm129_vm2, %v270_v44 }
 0x20e   :  { %1023 = vmatmul.mubr.msk.f32.gmra.mxu1 %vm129_vm2, %v272_v43  ;;  %v276_v45 = vpop.permute.xlu1 %275 }
 0x210   :  { %v274_v46 = vpop.permute.xlu0 %273 }
 0x211   :  { %1025 = vmatprep.mubr.msk.f32.mxu1 %vm129_vm2, %v274_v46 }
 0x212   :  { %1026 = vmatmul.mubr.msk.f32.gmra.mxu1 %vm129_vm2, %v276_v45  ;;  %v280_v47 = vpop.permute.xlu1 %279 }
 0x214   :  { %v278_v48 = vpop.permute.xlu0 %277 }
 0x215   :  { %1028 = vmatprep.mubr.msk.f32.mxu1 %vm129_vm2, %v278_v48 }
 0x216   :  { %1029 = vmatmul.mubr.msk.f32.gmra.mxu1 %vm129_vm2, %v280_v47 }
 0x22f   :  { %v1037_v49 = vpop.f32.mrf.mxu0 }
 0x230   :  { %765 = vrot.lane.b32.xlu1 %v1037_v49, %s1074_s13  ;;  %v1009_v53 = vpop.f32.mrf.mxu1 }
 0x231   :  { %v588_v50 = vpop.f32.mrf.mxu0 }
 0x232   :  { %763 = vrot.lane.b32.xlu0 %v588_v50, %s1074_s13  ;;  %v411_v58 = vpop.f32.mrf.mxu1 }
 0x234   :  { %685 = vrot.lane.b32.xlu1 %v1037_v49, %s1080_s20 }
 0x236   :  { %683 = vrot.lane.b32.xlu0 %v588_v50, %s1080_s20 }
 0x2a2   :  { %v766_v51 = vpop.permute.xlu1 %765  ;;  %v1040_v52 = vpop.f32.mrf.mxu0 }
 0x2a3   :  { %769 = vrot.lane.b32.xlu1 %v1040_v52, %s1074_s13  ;;  %v812_v10 = vadd.f32 %v1009_v53, %v766_v51 }
 0x2a4   :  { %v764_v54 = vpop.permute.xlu0 %763  ;;  %v598_v55 = vpop.f32.mrf.mxu0 }
 0x2a5   :  { %767 = vrot.lane.b32.xlu0 %v598_v55, %s1074_s13  ;;  %v811_v9 = vadd.f32 %v764_v54, %v411_v58 }
 0x2a6   :  { %v686_v56 = vpop.permute.xlu1 %685  ;;  %v1043_v57 = vpop.f32.mrf.mxu0 }
 0x2a7   :  { %v732_v59 = vsub.f32 %v1009_v53, %v686_v56  ;;  %773 = vrot.lane.b32.xlu1 %v1043_v57, %s1074_s13 }
 0x2a8   :  { %v684_v60 = vpop.permute.xlu0 %683  ;;  %v608_v61 = vpop.f32.mrf.mxu0 }
 0x2a9   :  { %748 = vst.msk [vmem:[%s1497_s5 + $0x8] sm:$0xff] %vm129_vm2, %v732_v59  ;;  %v731_v62 = vsub.f32 %v411_v58, %v684_v60  ;;  %771 = vrot.lane.b32.xlu0 %v608_v61, %s1074_s13 }
 0x2aa   :  { %v1046_v63 = vpop.f32.mrf.mxu0 }
 0x2ab   :  { %747 = vst.msk [vmem:[%s1497_s5] sm:$0xff] %vm129_vm2, %v731_v62  ;;  %777 = vrot.lane.b32.xlu1 %v1046_v63, %s1074_s13 }
 0x2ac   :  { %v618_v0 = vpop.f32.mrf.mxu0 }
 0x2ad   :  { %775 = vrot.lane.b32.xlu0 %v618_v0, %s1074_s13 }
 0x2ae   :  { %v1049_v1 = vpop.f32.mrf.mxu0 }
 0x2af   :  { %781 = vrot.lane.b32.xlu1 %v1049_v1, %s1074_s13 }
 0x2b0   :  { %v628_v2 = vpop.f32.mrf.mxu0 }
 0x2b1   :  { %779 = vrot.lane.b32.xlu0 %v628_v2, %s1074_s13 }
 0x2b2   :  { %v1052_v3 = vpop.f32.mrf.mxu0 }
 0x2b3   :  { %785 = vrot.lane.b32.xlu1 %v1052_v3, %s1074_s13 }
 0x2b4   :  { %v638_v4 = vpop.f32.mrf.mxu0 }
 0x2b5   :  { %783 = vrot.lane.b32.xlu0 %v638_v4, %s1074_s13 }
 0x2b6   :  { %v1055_v5 = vpop.f32.mrf.mxu0 }
 0x2b7   :  { %789 = vrot.lane.b32.xlu1 %v1055_v5, %s1074_s13 }
 0x2b8   :  { %v648_v6 = vpop.f32.mrf.mxu0 }
 0x2b9   :  { %787 = vrot.lane.b32.xlu0 %v648_v6, %s1074_s13 }
 0x2ba   :  { %v1058_v7 = vpop.f32.mrf.mxu0 }
 0x2bb   :  { %793 = vrot.lane.b32.xlu1 %v1058_v7, %s1074_s13 }
 0x2bc   :  { %v658_v8 = vpop.f32.mrf.mxu0 }
 0x2bd   :  { %791 = vrot.lane.b32.xlu0 %v658_v8, %s1074_s13 }
 0x2be   :  { %v1012_v11 = vpop.f32.mrf.mxu1 }
 0x2bf   :  { %689 = vrot.lane.b32.xlu1 %v1040_v52, %s1080_s20 }
 0x2c0   :  { %v421_v12 = vpop.f32.mrf.mxu1 }
 0x2c1   :  { %687 = vrot.lane.b32.xlu0 %v598_v55, %s1080_s20 }
 0x2c2   :  { %v1326_v13 = vpop.f32.mrf.mxu1 }
 0x2c3   :  { %693 = vrot.lane.b32.xlu1 %v1043_v57, %s1080_s20 }
 0x2c4   :  { %v1328_v14 = vpop.f32.mrf.mxu1 }
 0x2c5   :  { %691 = vrot.lane.b32.xlu0 %v608_v61, %s1080_s20 }
 0x2c6   :  { %v1330_v15 = vpop.f32.mrf.mxu1 }
 0x2c7   :  { %697 = vrot.lane.b32.xlu1 %v1046_v63, %s1080_s20 }
 0x2c8   :  { %v1332_v16 = vpop.f32.mrf.mxu1 }
 0x2c9   :  { %695 = vrot.lane.b32.xlu0 %v618_v0, %s1080_s20 }
 0x2ca   :  { %v1334_v17 = vpop.f32.mrf.mxu1 }
 0x2cb   :  { %701 = vrot.lane.b32.xlu1 %v1049_v1, %s1080_s20 }
 0x2cc   :  { %v1336_v20 = vpop.f32.mrf.mxu1 }
 0x2cd   :  { %699 = vrot.lane.b32.xlu0 %v628_v2, %s1080_s20 }
 0x2ce   :  { %v1341_v25 = vpop.f32.mrf.mxu1 }
 0x2cf   :  { %705 = vrot.lane.b32.xlu1 %v1052_v3, %s1080_s20 }
 0x2d0   :  { %v1347_v30 = vpop.f32.mrf.mxu1 }
 0x2d1   :  { %703 = vrot.lane.b32.xlu0 %v638_v4, %s1080_s20 }
 0x2d2   :  { %v1027_v35 = vpop.f32.mrf.mxu1 }
 0x2d3   :  { %709 = vrot.lane.b32.xlu1 %v1055_v5, %s1080_s20 }
 0x2d4   :  { %v471_v40 = vpop.f32.mrf.mxu1 }
 0x2d5   :  { %707 = vrot.lane.b32.xlu0 %v648_v6, %s1080_s20 }
 0x2d6   :  { %v1030_v45 = vpop.f32.mrf.mxu1 }
 0x2d7   :  { %713 = vrot.lane.b32.xlu1 %v1058_v7, %s1080_s20 }
 0x2d8   :  { %v481_v50 = vpop.f32.mrf.mxu1 }
 0x2d9   :  { %843 = vrot.lane.b32.xlu0 %v811_v9, %s1080_s20 }
 0x2db   :  { %845 = vrot.lane.b32.xlu1 %v812_v10, %s1080_s20 }
 0x2dd   :  { %711 = vrot.lane.b32.xlu0 %v658_v8, %s1080_s20 }
 0x315   :  { %v770_v18 = vpop.permute.xlu1 %769 }
 0x316   :  { %v814_v19 = vadd.f32 %v1012_v11, %v770_v18 }
 0x317   :  { %v768_v21 = vpop.permute.xlu0 %767 }
 0x318   :  { %v813_v22 = vadd.f32 %v768_v21, %v421_v12  ;;  %849 = vrot.lane.b32.xlu1 %v814_v19, %s1080_s20 }
 0x319   :  { %v774_v23 = vpop.permute.xlu1 %773 }
 0x31a   :  { %v816_v24 = vadd.f32 %v1326_v13, %v774_v23  ;;  %847 = vrot.lane.b32.xlu0 %v813_v22, %s1080_s20 }
 0x31b   :  { %v772_v26 = vpop.permute.xlu0 %771 }
 0x31c   :  { %v815_v27 = vadd.f32 %v772_v26, %v1328_v14  ;;  %853 = vrot.lane.b32.xlu1 %v816_v24, %s1080_s20 }
 0x31d   :  { %v778_v28 = vpop.permute.xlu1 %777 }
 0x31e   :  { %v818_v29 = vadd.f32 %v1330_v15, %v778_v28  ;;  %851 = vrot.lane.b32.xlu0 %v815_v27, %s1080_s20 }
 0x31f   :  { %v776_v31 = vpop.permute.xlu0 %775 }
 0x320   :  { %v817_v32 = vadd.f32 %v776_v31, %v1332_v16  ;;  %857 = vrot.lane.b32.xlu1 %v818_v29, %s1080_s20 }
 0x321   :  { %v782_v33 = vpop.permute.xlu1 %781 }
 0x322   :  { %v820_v34 = vadd.f32 %v1334_v17, %v782_v33  ;;  %855 = vrot.lane.b32.xlu0 %v817_v32, %s1080_s20 }
 0x323   :  { %v780_v36 = vpop.permute.xlu0 %779 }
 0x324   :  { %v819_v37 = vadd.f32 %v780_v36, %v1336_v20  ;;  %861 = vrot.lane.b32.xlu1 %v820_v34, %s1080_s20 }
 0x325   :  { %v786_v38 = vpop.permute.xlu1 %785 }
 0x326   :  { %v822_v39 = vadd.f32 %v1341_v25, %v786_v38  ;;  %859 = vrot.lane.b32.xlu0 %v819_v37, %s1080_s20 }
 0x327   :  { %v784_v41 = vpop.permute.xlu0 %783 }
 0x328   :  { %v821_v42 = vadd.f32 %v784_v41, %v1347_v30  ;;  %865 = vrot.lane.b32.xlu1 %v822_v39, %s1080_s20 }
 0x329   :  { %v790_v43 = vpop.permute.xlu1 %789 }
 0x32a   :  { %v824_v44 = vadd.f32 %v1027_v35, %v790_v43  ;;  %863 = vrot.lane.b32.xlu0 %v821_v42, %s1080_s20 }
 0x32b   :  { %v788_v46 = vpop.permute.xlu0 %787 }
 0x32c   :  { %v823_v47 = vadd.f32 %v788_v46, %v471_v40  ;;  %869 = vrot.lane.b32.xlu1 %v824_v44, %s1080_s20 }
 0x32d   :  { %v794_v48 = vpop.permute.xlu1 %793 }
 0x32e   :  { %v826_v49 = vadd.f32 %v1030_v45, %v794_v48  ;;  %867 = vrot.lane.b32.xlu0 %v823_v47, %s1080_s20 }
 0x32f   :  { %v792_v51 = vpop.permute.xlu0 %791 }
 0x330   :  { %v825_v52 = vadd.f32 %v792_v51, %v481_v50  ;;  %873 = vrot.lane.b32.xlu1 %v826_v49, %s1080_s20 }
 0x331   :  { %v690_v53 = vpop.permute.xlu1 %689 }
 0x332   :  { %v734_v54 = vsub.f32 %v1012_v11, %v690_v53  ;;  %871 = vrot.lane.b32.xlu0 %v825_v52, %s1080_s20 }
 0x333   :  { %v688_v55 = vpop.permute.xlu0 %687 }
 0x334   :  { %750 = vst.msk [vmem:[%s1497_s5 + $0x18] sm:$0xff] %vm129_vm2, %v734_v54  ;;  %v733_v56 = vsub.f32 %v421_v12, %v688_v55 }
 0x335   :  { %v694_v57 = vpop.permute.xlu1 %693 }
 0x336   :  { %749 = vst.msk [vmem:[%s1497_s5 + $0x10] sm:$0xff] %vm129_vm2, %v733_v56  ;;  %v736_v58 = vsub.f32 %v1326_v13, %v694_v57 }
 0x337   :  { %v692_v59 = vpop.permute.xlu0 %691 }
 0x338   :  { %752 = vst.msk [vmem:[%s1497_s5 + $0x28] sm:$0xff] %vm129_vm2, %v736_v58  ;;  %v735_v60 = vsub.f32 %v1328_v14, %v692_v59 }
 0x339   :  { %v698_v61 = vpop.permute.xlu1 %697 }
 0x33a   :  { %751 = vst.msk [vmem:[%s1497_s5 + $0x20] sm:$0xff] %vm129_vm2, %v735_v60  ;;  %v738_v62 = vsub.f32 %v1330_v15, %v698_v61 }
 0x33b   :  { %v696_v63 = vpop.permute.xlu0 %695 }
 0x33c   :  { %754 = vst.msk [vmem:[%s1497_s5 + $0x38] sm:$0xff] %vm129_vm2, %v738_v62  ;;  %v737_v0 = vsub.f32 %v1332_v16, %v696_v63 }
 0x33d   :  { %v702_v1 = vpop.permute.xlu1 %701 }
 0x33e   :  { %753 = vst.msk [vmem:[%s1497_s5 + $0x30] sm:$0xff] %vm129_vm2, %v737_v0  ;;  %v740_v2 = vsub.f32 %v1334_v17, %v702_v1 }
 0x33f   :  { %v700_v3 = vpop.permute.xlu0 %699 }
 0x340   :  { %756 = vst.msk [vmem:[%s1497_s5 + $0x48] sm:$0xff] %vm129_vm2, %v740_v2  ;;  %v739_v4 = vsub.f32 %v1336_v20, %v700_v3 }
 0x341   :  { %v706_v5 = vpop.permute.xlu1 %705 }
 0x342   :  { %755 = vst.msk [vmem:[%s1497_s5 + $0x40] sm:$0xff] %vm129_vm2, %v739_v4  ;;  %v742_v6 = vsub.f32 %v1341_v25, %v706_v5 }
 0x343   :  { %v704_v7 = vpop.permute.xlu0 %703 }
 0x344   :  { %758 = vst.msk [vmem:[%s1497_s5 + $0x58] sm:$0xff] %vm129_vm2, %v742_v6  ;;  %v741_v8 = vsub.f32 %v1347_v30, %v704_v7 }
 0x345   :  { %v710_v9 = vpop.permute.xlu1 %709 }
 0x346   :  { %757 = vst.msk [vmem:[%s1497_s5 + $0x50] sm:$0xff] %vm129_vm2, %v741_v8  ;;  %v744_v10 = vsub.f32 %v1027_v35, %v710_v9 }
 0x347   :  { %v708_v11 = vpop.permute.xlu0 %707 }
 0x348   :  { %760 = vst.msk [vmem:[%s1497_s5 + $0x68] sm:$0xff] %vm129_vm2, %v744_v10  ;;  %v743_v12 = vsub.f32 %v471_v40, %v708_v11 }
 0x349   :  { %v714_v13 = vpop.permute.xlu1 %713 }
 0x34a   :  { %759 = vst.msk [vmem:[%s1497_s5 + $0x60] sm:$0xff] %vm129_vm2, %v743_v12  ;;  %v746_v14 = vsub.f32 %v1030_v45, %v714_v13 }
 0x34b   :  { %v844_v15 = vpop.permute.xlu0 %843 }
 0x34c   :  { %762 = vst.msk [vmem:[%s1497_s5 + $0x78] sm:$0xff] %vm129_vm2, %v746_v14  ;;  %891 = vst.msk [vmem:[%s1498_s6] sm:$0xff] %vm129_vm2, %v844_v15 }
 0x34d   :  { %v846_v16 = vpop.permute.xlu1 %845 }
 0x34e   :  { %892 = vst.msk [vmem:[%s1498_s6 + $0x8] sm:$0xff] %vm129_vm2, %v846_v16 }
 0x34f   :  { %v712_v17 = vpop.permute.xlu0 %711 }
 0x350   :  { %v745_v18 = vsub.f32 %v481_v50, %v712_v17 }
 0x352   :  { %761 = vst.msk [vmem:[%s1497_s5 + $0x70] sm:$0xff] %vm129_vm2, %v745_v18 }
 0x38a   :  { %v850_v19 = vpop.permute.xlu1 %849 }
 0x38b   :  { %894 = vst.msk [vmem:[%s1498_s6 + $0x18] sm:$0xff] %vm129_vm2, %v850_v19 }
 0x38c   :  { %v848_v20 = vpop.permute.xlu0 %847 }
 0x38d   :  { %893 = vst.msk [vmem:[%s1498_s6 + $0x10] sm:$0xff] %vm129_vm2, %v848_v20 }
 0x38e   :  { %v854_v21 = vpop.permute.xlu1 %853 }
 0x38f   :  { %896 = vst.msk [vmem:[%s1498_s6 + $0x28] sm:$0xff] %vm129_vm2, %v854_v21 }
 0x390   :  { %v852_v22 = vpop.permute.xlu0 %851 }
 0x391   :  { %895 = vst.msk [vmem:[%s1498_s6 + $0x20] sm:$0xff] %vm129_vm2, %v852_v22 }
 0x392   :  { %v858_v23 = vpop.permute.xlu1 %857 }
 0x393   :  { %898 = vst.msk [vmem:[%s1498_s6 + $0x38] sm:$0xff] %vm129_vm2, %v858_v23 }
 0x394   :  { %v856_v24 = vpop.permute.xlu0 %855 }
 0x395   :  { %897 = vst.msk [vmem:[%s1498_s6 + $0x30] sm:$0xff] %vm129_vm2, %v856_v24 }
 0x396   :  { %v862_v25 = vpop.permute.xlu1 %861 }
 0x397   :  { %900 = vst.msk [vmem:[%s1498_s6 + $0x48] sm:$0xff] %vm129_vm2, %v862_v25 }
 0x398   :  { %v860_v26 = vpop.permute.xlu0 %859 }
 0x399   :  { %899 = vst.msk [vmem:[%s1498_s6 + $0x40] sm:$0xff] %vm129_vm2, %v860_v26 }
 0x39a   :  { %v866_v27 = vpop.permute.xlu1 %865 }
 0x39b   :  { %902 = vst.msk [vmem:[%s1498_s6 + $0x58] sm:$0xff] %vm129_vm2, %v866_v27 }
 0x39c   :  { %v864_v28 = vpop.permute.xlu0 %863 }
 0x39d   :  { %901 = vst.msk [vmem:[%s1498_s6 + $0x50] sm:$0xff] %vm129_vm2, %v864_v28 }
 0x39e   :  { %v870_v29 = vpop.permute.xlu1 %869 }
 0x39f   :  { %904 = vst.msk [vmem:[%s1498_s6 + $0x68] sm:$0xff] %vm129_vm2, %v870_v29 }
 0x3a0   :  { %v868_v30 = vpop.permute.xlu0 %867 }
 0x3a1   :  { %903 = vst.msk [vmem:[%s1498_s6 + $0x60] sm:$0xff] %vm129_vm2, %v868_v30 }
 0x3a2   :  { %v874_v31 = vpop.permute.xlu1 %873 }
 0x3a3   :  { %906 = vst.msk [vmem:[%s1498_s6 + $0x78] sm:$0xff] %vm129_vm2, %v874_v31 }
 0x3a4   :  { %v872_v32 = vpop.permute.xlu0 %871 }
 0x3a5   :  { %905 = vst.msk [vmem:[%s1498_s6 + $0x70] sm:$0xff] %vm129_vm2, %v872_v32 }

</bundles_post_ra>
